<compile_context>
chip_gen: v6e
topology: v6e:2x2x1
jax: 0.10.0
libtpu: 0.0.40
codegen_flags: <defaults>
</compile_context>

<pallas_src>
import functools

import jax
import jax.numpy as jnp
from jax.experimental import pallas as pl
from jax.experimental.pallas import tpu as pltpu

# Small, self-consistent sizes (original module uses EMBEDDING_SIZE = 768; the
# Block only works when n_embd == EMBEDDING_SIZE, so we shrink both together).
EMBEDDING_SIZE = 32
N_HEAD = 4
HEAD_SIZE = EMBEDDING_SIZE // N_HEAD
LN_EPS = 1e-5  # torch nn.LayerNorm default


def _layernorm(x, gamma, beta):
    # x: (N, C); gamma/beta: (1, C); normalize over last dim.
    mu = jnp.mean(x, axis=-1, keepdims=True)
    var = jnp.mean((x - mu) ** 2, axis=-1, keepdims=True)
    return (x - mu) * jax.lax.rsqrt(var + LN_EPS) * gamma + beta


def fused_block_kernel(x_ref, g1_ref, b1_ref, wq_ref, wk_ref, wv_ref,
                       wo_ref, bo_ref, g2_ref, b2_ref,
                       w1_ref, fb1_ref, w2_ref, fb2_ref, o_ref,
                       *, batch, seq, n_head, head_size):
    n_rows, n_embd = x_ref.shape            # (B*T, C)
    x = x_ref[...]

    # ---- attention sub-block -------------------------------------------
    xn = _layernorm(x, g1_ref[...], b1_ref[...])

    # One full-width MXU push per projection (heads concatenated on out dim).
    q = jnp.dot(xn, wq_ref[...], preferred_element_type=jnp.float32)
    k = jnp.dot(xn, wk_ref[...], preferred_element_type=jnp.float32)
    v = jnp.dot(xn, wv_ref[...], preferred_element_type=jnp.float32)

    scale = n_embd ** -0.5  # torch uses C**-0.5 with C = embedding size

    # Residual + output-projection bias; per-head contributions accumulate as
    # sum_h head_h @ Wo[h]  (equivalent to concat(heads) @ Wo, but with no
    # lane concatenate and no explicit transpose).
    acc = x + bo_ref[...]
    for h in range(n_head):                 # static unrolled, n_head is tiny
        lo = h * head_size
        qh = q[:, lo:lo + head_size].reshape(batch, seq, head_size)
        kh = k[:, lo:lo + head_size].reshape(batch, seq, head_size)
        vh = v[:, lo:lo + head_size].reshape(batch, seq, head_size)
        s = jnp.einsum("btd,bsd->bts", qh, kh,
                       preferred_element_type=jnp.float32) * scale
        s = s - jnp.max(s, axis=-1, keepdims=True)
        p = jnp.exp(s)
        p = p * pl.reciprocal(jnp.sum(p, axis=-1, keepdims=True), approx=True)
        oh = jnp.einsum("bts,bsd->btd", p, vh,
                        preferred_element_type=jnp.float32)
        acc = acc + jnp.dot(oh.reshape(n_rows, head_size), wo_ref[h],
                            preferred_element_type=jnp.float32)

    # ---- feed-forward sub-block ----------------------------------------
    xn2 = _layernorm(acc, g2_ref[...], b2_ref[...])
    hh = jnp.dot(xn2, w1_ref[...], preferred_element_type=jnp.float32) + fb1_ref[...]
    hh = jnp.maximum(hh, 0.0)               # ReLU
    y = jnp.dot(hh, w2_ref[...], preferred_element_type=jnp.float32) + fb2_ref[...]
    o_ref[...] = acc + y                    # second residual


@jax.jit
def block_forward(x, params):
    B, T, C = x.shape
    N = B * T
    x2 = x.reshape(N, C)                             # fold batch into rows
    wo3 = params["wo"].reshape(N_HEAD, HEAD_SIZE, C)  # head-major output proj

    kernel = functools.partial(fused_block_kernel, batch=B, seq=T,
                               n_head=N_HEAD, head_size=HEAD_SIZE)
    vmem_spec = pl.BlockSpec(memory_space=pltpu.MemorySpace.VMEM)

    out2 = pl.pallas_call(
        kernel,
        out_shape=jax.ShapeDtypeStruct((N, C), jnp.float32),
        in_specs=[vmem_spec] * 14,
        out_specs=vmem_spec,
        input_output_aliases={0: 0},   # residual input aliases the output
    )(x2, params["ln1_g"], params["ln1_b"], params["wq"], params["wk"],
      params["wv"], wo3, params["bo"], params["ln2_g"], params["ln2_b"],
      params["w1"], params["b1"], params["w2"], params["b2"])
    return out2.reshape(B, T, C)


def init_params(key, C):
    H = 4 * C
    ks = jax.random.split(key, 10)
    scale = 0.02
    return {
        "ln1_g": jnp.ones((1, C), jnp.float32) + scale * jax.random.normal(ks[0], (1, C)),
        "ln1_b": scale * jax.random.normal(ks[1], (1, C), jnp.float32),
        "wq": scale * jax.random.normal(ks[2], (C, C), jnp.float32),
        "wk": scale * jax.random.normal(ks[3], (C, C), jnp.float32),
        "wv": scale * jax.random.normal(ks[4], (C, C), jnp.float32),
        "wo": scale * jax.random.normal(ks[5], (C, C), jnp.float32),
        "bo": scale * jax.random.normal(ks[6], (1, C), jnp.float32),
        "ln2_g": jnp.ones((1, C), jnp.float32) + scale * jax.random.normal(ks[7], (1, C)),
        "ln2_b": scale * jax.random.normal(ks[8], (1, C), jnp.float32),
        "w1": scale * jax.random.normal(ks[9], (C, H), jnp.float32),
        "b1": jnp.zeros((1, H), jnp.float32),
        "w2": scale * jax.random.normal(jax.random.fold_in(key, 99), (H, C), jnp.float32),
        "b2": jnp.zeros((1, C), jnp.float32),
    }


def block_reference(x, p):
    """Pure-JAX reference mirroring the PyTorch semantics exactly."""
    def ln(z, g, b):
        mu = jnp.mean(z, axis=-1, keepdims=True)
        var = jnp.mean((z - mu) ** 2, axis=-1, keepdims=True)
        return (z - mu) / jnp.sqrt(var + LN_EPS) * g[0] + b[0]

    B, T, C = x.shape
    xn = ln(x, p["ln1_g"], p["ln1_b"])
    q = xn @ p["wq"]
    k = xn @ p["wk"]
    v = xn @ p["wv"]
    outs = []
    for h in range(N_HEAD):
        sl = slice(h * HEAD_SIZE, (h + 1) * HEAD_SIZE)
        s = jnp.einsum("btd,bsd->bts", q[..., sl], k[..., sl]) * C ** (-0.5)
        a = jax.nn.softmax(s, axis=-1)
        outs.append(jnp.einsum("bts,bsd->btd", a, v[..., sl]))
    att = jnp.concatenate(outs, axis=-1) @ p["wo"] + p["bo"][0]
    x = x + att
    xn = ln(x, p["ln2_g"], p["ln2_b"])
    ff = jnp.maximum(xn @ p["w1"] + p["b1"][0], 0.0) @ p["w2"] + p["b2"][0]
    return x + ff


if __name__ == "__main__":
    key = jax.random.PRNGKey(0)
    k_x, k_p = jax.random.split(key)

    B, T, C = 2, 8, EMBEDDING_SIZE
    x = jax.random.normal(k_x, (B, T, C), jnp.float32)
    params = init_params(k_p, C)

    out = jax.block_until_ready(block_forward(x, params))
    ref = block_reference(x, params)

    # Slightly loose tolerance: softmax denominator uses the approximate EUP
    # reciprocal (pl.reciprocal(..., approx=True)).
    if not jnp.allclose(out, ref, rtol=2e-3, atol=2e-3):
        raise AssertionError(
            f"mismatch: max abs err = {float(jnp.max(jnp.abs(out - ref)))}")

    print("KERNEL_OK")
</pallas_src>

<mosaic_0001>
module attributes {stable_mosaic.version = 11 : i64} {
  func.func @fused_block_kernel(%arg0: memref<16x32xf32, #tpu.memory_space<vmem>>, %arg1: memref<1x32xf32, #tpu.memory_space<vmem>>, %arg2: memref<1x32xf32, #tpu.memory_space<vmem>>, %arg3: memref<32x32xf32, #tpu.memory_space<vmem>>, %arg4: memref<32x32xf32, #tpu.memory_space<vmem>>, %arg5: memref<32x32xf32, #tpu.memory_space<vmem>>, %arg6: memref<4x8x32xf32, #tpu.memory_space<vmem>>, %arg7: memref<1x32xf32, #tpu.memory_space<vmem>>, %arg8: memref<1x32xf32, #tpu.memory_space<vmem>>, %arg9: memref<1x32xf32, #tpu.memory_space<vmem>>, %arg10: memref<32x128xf32, #tpu.memory_space<vmem>>, %arg11: memref<1x128xf32, #tpu.memory_space<vmem>>, %arg12: memref<128x32xf32, #tpu.memory_space<vmem>>, %arg13: memref<1x32xf32, #tpu.memory_space<vmem>>, %arg14: memref<16x32xf32, #tpu.memory_space<vmem>>) attributes {dimension_semantics = [], scalar_prefetch = 0 : i64, scratch_operands = 0 : i64, tpu.core_type = #tpu.core_type<tc>} {
    %c0 = arith.constant 0 : index
    %c0_0 = arith.constant 0 : index
    %0 = vector.load %arg0[%c0, %c0_0] : memref<16x32xf32, #tpu.memory_space<vmem>>, vector<16x32xf32>
    %c0_1 = arith.constant 0 : index
    %c0_2 = arith.constant 0 : index
    %1 = vector.load %arg1[%c0_1, %c0_2] : memref<1x32xf32, #tpu.memory_space<vmem>>, vector<1x32xf32>
    %c0_3 = arith.constant 0 : index
    %c0_4 = arith.constant 0 : index
    %2 = vector.load %arg2[%c0_3, %c0_4] : memref<1x32xf32, #tpu.memory_space<vmem>>, vector<1x32xf32>
    %cst = arith.constant dense<0.000000e+00> : vector<16xf32>
    %3 = vector.multi_reduction <add>, %0, %cst [1] : vector<16x32xf32> to vector<16xf32>
    %4 = vector.shape_cast %3 : vector<16xf32> to vector<16x1xf32>
    %cst_5 = arith.constant 3.200000e+01 : f32
    %5 = vector.broadcast %cst_5 : f32 to vector<16x1xf32>
    %6 = arith.divf %4, %5 : vector<16x1xf32>
    %7 = vector.broadcast %6 : vector<16x1xf32> to vector<16x32xf32>
    %8 = arith.subf %0, %7 : vector<16x32xf32>
    %9 = arith.mulf %8, %8 : vector<16x32xf32>
    %cst_6 = arith.constant dense<0.000000e+00> : vector<16xf32>
    %10 = vector.multi_reduction <add>, %9, %cst_6 [1] : vector<16x32xf32> to vector<16xf32>
    %11 = vector.shape_cast %10 : vector<16xf32> to vector<16x1xf32>
    %cst_7 = arith.constant 3.200000e+01 : f32
    %12 = vector.broadcast %cst_7 : f32 to vector<16x1xf32>
    %13 = arith.divf %11, %12 : vector<16x1xf32>
    %14 = vector.broadcast %6 : vector<16x1xf32> to vector<16x32xf32>
    %15 = arith.subf %0, %14 : vector<16x32xf32>
    %cst_8 = arith.constant 9.99999974E-6 : f32
    %16 = vector.broadcast %cst_8 : f32 to vector<16x1xf32>
    %17 = arith.addf %13, %16 : vector<16x1xf32>
    %18 = math.rsqrt %17 : vector<16x1xf32>
    %19 = vector.broadcast %18 : vector<16x1xf32> to vector<16x32xf32>
    %20 = arith.mulf %15, %19 : vector<16x32xf32>
    %21 = vector.broadcast %1 : vector<1x32xf32> to vector<16x32xf32>
    %22 = arith.mulf %20, %21 : vector<16x32xf32>
    %23 = vector.broadcast %2 : vector<1x32xf32> to vector<16x32xf32>
    %24 = arith.addf %22, %23 : vector<16x32xf32>
    %c0_9 = arith.constant 0 : index
    %c0_10 = arith.constant 0 : index
    %25 = vector.load %arg3[%c0_9, %c0_10] : memref<32x32xf32, #tpu.memory_space<vmem>>, vector<32x32xf32>
    %cst_11 = arith.constant dense<0.000000e+00> : vector<16x32xf32>
    %26 = tpu.matmul %24, %25, %cst_11 {dimension_numbers = #tpu.dot_dimension_numbers<[1], [0], [0], [1], [0, 0, 1, 1], [], []>} : vector<16x32xf32>, vector<32x32xf32>, vector<16x32xf32> -> vector<16x32xf32>
    %c0_12 = arith.constant 0 : index
    %c0_13 = arith.constant 0 : index
    %27 = vector.load %arg4[%c0_12, %c0_13] : memref<32x32xf32, #tpu.memory_space<vmem>>, vector<32x32xf32>
    %cst_14 = arith.constant dense<0.000000e+00> : vector<16x32xf32>
    %28 = tpu.matmul %24, %27, %cst_14 {dimension_numbers = #tpu.dot_dimension_numbers<[1], [0], [0], [1], [0, 0, 1, 1], [], []>} : vector<16x32xf32>, vector<32x32xf32>, vector<16x32xf32> -> vector<16x32xf32>
    %c0_15 = arith.constant 0 : index
    %c0_16 = arith.constant 0 : index
    %29 = vector.load %arg5[%c0_15, %c0_16] : memref<32x32xf32, #tpu.memory_space<vmem>>, vector<32x32xf32>
    %cst_17 = arith.constant dense<0.000000e+00> : vector<16x32xf32>
    %30 = tpu.matmul %24, %29, %cst_17 {dimension_numbers = #tpu.dot_dimension_numbers<[1], [0], [0], [1], [0, 0, 1, 1], [], []>} : vector<16x32xf32>, vector<32x32xf32>, vector<16x32xf32> -> vector<16x32xf32>
    %c0_18 = arith.constant 0 : index
    %c0_19 = arith.constant 0 : index
    %31 = vector.load %arg7[%c0_18, %c0_19] : memref<1x32xf32, #tpu.memory_space<vmem>>, vector<1x32xf32>
    %32 = vector.broadcast %31 : vector<1x32xf32> to vector<16x32xf32>
    %33 = arith.addf %0, %32 : vector<16x32xf32>
    %34 = vector.extract_strided_slice %26 {offsets = [0, 0], sizes = [16, 8], strides = [1, 1]} : vector<16x32xf32> to vector<16x8xf32>
    %35 = vector.shape_cast %34 : vector<16x8xf32> to vector<2x8x8xf32>
    %36 = vector.extract_strided_slice %28 {offsets = [0, 0], sizes = [16, 8], strides = [1, 1]} : vector<16x32xf32> to vector<16x8xf32>
    %37 = vector.shape_cast %36 : vector<16x8xf32> to vector<2x8x8xf32>
    %38 = vector.extract_strided_slice %30 {offsets = [0, 0], sizes = [16, 8], strides = [1, 1]} : vector<16x32xf32> to vector<16x8xf32>
    %39 = vector.shape_cast %38 : vector<16x8xf32> to vector<2x8x8xf32>
    "tpu.trace_start"() <{level = 10 : i32, message = "btd,bsd->bts"}> : () -> ()
    %cst_20 = arith.constant dense<0.000000e+00> : vector<2x8x8xf32>
    %40 = tpu.matmul %35, %37, %cst_20 {dimension_numbers = #tpu.dot_dimension_numbers<[2], [2], [1], [1], [0, 0, 0, 1, 1, 1], [0], [0]>} : vector<2x8x8xf32>, vector<2x8x8xf32>, vector<2x8x8xf32> -> vector<2x8x8xf32>
    "tpu.trace_stop"() : () -> ()
    %cst_21 = arith.constant 0.176776692 : f32
    %41 = vector.broadcast %cst_21 : f32 to vector<2x8x8xf32>
    %42 = arith.mulf %40, %41 : vector<2x8x8xf32>
    %cst_22 = arith.constant dense<0xFF800000> : vector<2x8xf32>
    %43 = vector.multi_reduction <maximumf>, %42, %cst_22 [2] : vector<2x8x8xf32> to vector<2x8xf32>
    %44 = vector.shape_cast %43 : vector<2x8xf32> to vector<2x8x1xf32>
    %45 = vector.broadcast %44 : vector<2x8x1xf32> to vector<2x8x8xf32>
    %46 = arith.subf %42, %45 : vector<2x8x8xf32>
    %47 = math.exp %46 : vector<2x8x8xf32>
    %cst_23 = arith.constant dense<0.000000e+00> : vector<2x8xf32>
    %48 = vector.multi_reduction <add>, %47, %cst_23 [2] : vector<2x8x8xf32> to vector<2x8xf32>
    %49 = vector.shape_cast %48 : vector<2x8xf32> to vector<2x8x1xf32>
    %50 = tpu.reciprocal %49 {approx = true} : vector<2x8x1xf32> -> vector<2x8x1xf32>
    %51 = vector.broadcast %50 : vector<2x8x1xf32> to vector<2x8x8xf32>
    %52 = arith.mulf %47, %51 : vector<2x8x8xf32>
    "tpu.trace_start"() <{level = 10 : i32, message = "bts,bsd->btd"}> : () -> ()
    %cst_24 = arith.constant dense<0.000000e+00> : vector<2x8x8xf32>
    %53 = tpu.matmul %52, %39, %cst_24 {dimension_numbers = #tpu.dot_dimension_numbers<[2], [1], [1], [2], [0, 0, 0, 1, 1, 2], [0], [0]>} : vector<2x8x8xf32>, vector<2x8x8xf32>, vector<2x8x8xf32> -> vector<2x8x8xf32>
    "tpu.trace_stop"() : () -> ()
    %54 = vector.shape_cast %53 : vector<2x8x8xf32> to vector<16x8xf32>
    %c0_25 = arith.constant 0 : index
    %c0_26 = arith.constant 0 : index
    %c0_27 = arith.constant 0 : index
    %55 = vector.load %arg6[%c0_25, %c0_26, %c0_27] : memref<4x8x32xf32, #tpu.memory_space<vmem>>, vector<1x8x32xf32>
    %56 = vector.shape_cast %55 : vector<1x8x32xf32> to vector<8x32xf32>
    %cst_28 = arith.constant dense<0.000000e+00> : vector<16x32xf32>
    %57 = tpu.matmul %54, %56, %cst_28 {dimension_numbers = #tpu.dot_dimension_numbers<[1], [0], [0], [1], [0, 0, 1, 1], [], []>} : vector<16x8xf32>, vector<8x32xf32>, vector<16x32xf32> -> vector<16x32xf32>
    %58 = arith.addf %33, %57 : vector<16x32xf32>
    %59 = vector.extract_strided_slice %26 {offsets = [0, 8], sizes = [16, 8], strides = [1, 1]} : vector<16x32xf32> to vector<16x8xf32>
    %60 = vector.shape_cast %59 : vector<16x8xf32> to vector<2x8x8xf32>
    %61 = vector.extract_strided_slice %28 {offsets = [0, 8], sizes = [16, 8], strides = [1, 1]} : vector<16x32xf32> to vector<16x8xf32>
    %62 = vector.shape_cast %61 : vector<16x8xf32> to vector<2x8x8xf32>
    %63 = vector.extract_strided_slice %30 {offsets = [0, 8], sizes = [16, 8], strides = [1, 1]} : vector<16x32xf32> to vector<16x8xf32>
    %64 = vector.shape_cast %63 : vector<16x8xf32> to vector<2x8x8xf32>
    "tpu.trace_start"() <{level = 10 : i32, message = "btd,bsd->bts"}> : () -> ()
    %cst_29 = arith.constant dense<0.000000e+00> : vector<2x8x8xf32>
    %65 = tpu.matmul %60, %62, %cst_29 {dimension_numbers = #tpu.dot_dimension_numbers<[2], [2], [1], [1], [0, 0, 0, 1, 1, 1], [0], [0]>} : vector<2x8x8xf32>, vector<2x8x8xf32>, vector<2x8x8xf32> -> vector<2x8x8xf32>
    "tpu.trace_stop"() : () -> ()
    %cst_30 = arith.constant 0.176776692 : f32
    %66 = vector.broadcast %cst_30 : f32 to vector<2x8x8xf32>
    %67 = arith.mulf %65, %66 : vector<2x8x8xf32>
    %cst_31 = arith.constant dense<0xFF800000> : vector<2x8xf32>
    %68 = vector.multi_reduction <maximumf>, %67, %cst_31 [2] : vector<2x8x8xf32> to vector<2x8xf32>
    %69 = vector.shape_cast %68 : vector<2x8xf32> to vector<2x8x1xf32>
    %70 = vector.broadcast %69 : vector<2x8x1xf32> to vector<2x8x8xf32>
    %71 = arith.subf %67, %70 : vector<2x8x8xf32>
    %72 = math.exp %71 : vector<2x8x8xf32>
    %cst_32 = arith.constant dense<0.000000e+00> : vector<2x8xf32>
    %73 = vector.multi_reduction <add>, %72, %cst_32 [2] : vector<2x8x8xf32> to vector<2x8xf32>
    %74 = vector.shape_cast %73 : vector<2x8xf32> to vector<2x8x1xf32>
    %75 = tpu.reciprocal %74 {approx = true} : vector<2x8x1xf32> -> vector<2x8x1xf32>
    %76 = vector.broadcast %75 : vector<2x8x1xf32> to vector<2x8x8xf32>
    %77 = arith.mulf %72, %76 : vector<2x8x8xf32>
    "tpu.trace_start"() <{level = 10 : i32, message = "bts,bsd->btd"}> : () -> ()
    %cst_33 = arith.constant dense<0.000000e+00> : vector<2x8x8xf32>
    %78 = tpu.matmul %77, %64, %cst_33 {dimension_numbers = #tpu.dot_dimension_numbers<[2], [1], [1], [2], [0, 0, 0, 1, 1, 2], [0], [0]>} : vector<2x8x8xf32>, vector<2x8x8xf32>, vector<2x8x8xf32> -> vector<2x8x8xf32>
    "tpu.trace_stop"() : () -> ()
    %79 = vector.shape_cast %78 : vector<2x8x8xf32> to vector<16x8xf32>
    %c1 = arith.constant 1 : index
    %c0_34 = arith.constant 0 : index
    %c0_35 = arith.constant 0 : index
    %80 = vector.load %arg6[%c1, %c0_34, %c0_35] : memref<4x8x32xf32, #tpu.memory_space<vmem>>, vector<1x8x32xf32>
    %81 = vector.shape_cast %80 : vector<1x8x32xf32> to vector<8x32xf32>
    %cst_36 = arith.constant dense<0.000000e+00> : vector<16x32xf32>
    %82 = tpu.matmul %79, %81, %cst_36 {dimension_numbers = #tpu.dot_dimension_numbers<[1], [0], [0], [1], [0, 0, 1, 1], [], []>} : vector<16x8xf32>, vector<8x32xf32>, vector<16x32xf32> -> vector<16x32xf32>
    %83 = arith.addf %58, %82 : vector<16x32xf32>
    %84 = vector.extract_strided_slice %26 {offsets = [0, 16], sizes = [16, 8], strides = [1, 1]} : vector<16x32xf32> to vector<16x8xf32>
    %85 = vector.shape_cast %84 : vector<16x8xf32> to vector<2x8x8xf32>
    %86 = vector.extract_strided_slice %28 {offsets = [0, 16], sizes = [16, 8], strides = [1, 1]} : vector<16x32xf32> to vector<16x8xf32>
    %87 = vector.shape_cast %86 : vector<16x8xf32> to vector<2x8x8xf32>
    %88 = vector.extract_strided_slice %30 {offsets = [0, 16], sizes = [16, 8], strides = [1, 1]} : vector<16x32xf32> to vector<16x8xf32>
    %89 = vector.shape_cast %88 : vector<16x8xf32> to vector<2x8x8xf32>
    "tpu.trace_start"() <{level = 10 : i32, message = "btd,bsd->bts"}> : () -> ()
    %cst_37 = arith.constant dense<0.000000e+00> : vector<2x8x8xf32>
    %90 = tpu.matmul %85, %87, %cst_37 {dimension_numbers = #tpu.dot_dimension_numbers<[2], [2], [1], [1], [0, 0, 0, 1, 1, 1], [0], [0]>} : vector<2x8x8xf32>, vector<2x8x8xf32>, vector<2x8x8xf32> -> vector<2x8x8xf32>
    "tpu.trace_stop"() : () -> ()
    %cst_38 = arith.constant 0.176776692 : f32
    %91 = vector.broadcast %cst_38 : f32 to vector<2x8x8xf32>
    %92 = arith.mulf %90, %91 : vector<2x8x8xf32>
    %cst_39 = arith.constant dense<0xFF800000> : vector<2x8xf32>
    %93 = vector.multi_reduction <maximumf>, %92, %cst_39 [2] : vector<2x8x8xf32> to vector<2x8xf32>
    %94 = vector.shape_cast %93 : vector<2x8xf32> to vector<2x8x1xf32>
    %95 = vector.broadcast %94 : vector<2x8x1xf32> to vector<2x8x8xf32>
    %96 = arith.subf %92, %95 : vector<2x8x8xf32>
    %97 = math.exp %96 : vector<2x8x8xf32>
    %cst_40 = arith.constant dense<0.000000e+00> : vector<2x8xf32>
    %98 = vector.multi_reduction <add>, %97, %cst_40 [2] : vector<2x8x8xf32> to vector<2x8xf32>
    %99 = vector.shape_cast %98 : vector<2x8xf32> to vector<2x8x1xf32>
    %100 = tpu.reciprocal %99 {approx = true} : vector<2x8x1xf32> -> vector<2x8x1xf32>
    %101 = vector.broadcast %100 : vector<2x8x1xf32> to vector<2x8x8xf32>
    %102 = arith.mulf %97, %101 : vector<2x8x8xf32>
    "tpu.trace_start"() <{level = 10 : i32, message = "bts,bsd->btd"}> : () -> ()
    %cst_41 = arith.constant dense<0.000000e+00> : vector<2x8x8xf32>
    %103 = tpu.matmul %102, %89, %cst_41 {dimension_numbers = #tpu.dot_dimension_numbers<[2], [1], [1], [2], [0, 0, 0, 1, 1, 2], [0], [0]>} : vector<2x8x8xf32>, vector<2x8x8xf32>, vector<2x8x8xf32> -> vector<2x8x8xf32>
    "tpu.trace_stop"() : () -> ()
    %104 = vector.shape_cast %103 : vector<2x8x8xf32> to vector<16x8xf32>
    %c2 = arith.constant 2 : index
    %c0_42 = arith.constant 0 : index
    %c0_43 = arith.constant 0 : index
    %105 = vector.load %arg6[%c2, %c0_42, %c0_43] : memref<4x8x32xf32, #tpu.memory_space<vmem>>, vector<1x8x32xf32>
    %106 = vector.shape_cast %105 : vector<1x8x32xf32> to vector<8x32xf32>
    %cst_44 = arith.constant dense<0.000000e+00> : vector<16x32xf32>
    %107 = tpu.matmul %104, %106, %cst_44 {dimension_numbers = #tpu.dot_dimension_numbers<[1], [0], [0], [1], [0, 0, 1, 1], [], []>} : vector<16x8xf32>, vector<8x32xf32>, vector<16x32xf32> -> vector<16x32xf32>
    %108 = arith.addf %83, %107 : vector<16x32xf32>
    %109 = vector.extract_strided_slice %26 {offsets = [0, 24], sizes = [16, 8], strides = [1, 1]} : vector<16x32xf32> to vector<16x8xf32>
    %110 = vector.shape_cast %109 : vector<16x8xf32> to vector<2x8x8xf32>
    %111 = vector.extract_strided_slice %28 {offsets = [0, 24], sizes = [16, 8], strides = [1, 1]} : vector<16x32xf32> to vector<16x8xf32>
    %112 = vector.shape_cast %111 : vector<16x8xf32> to vector<2x8x8xf32>
    %113 = vector.extract_strided_slice %30 {offsets = [0, 24], sizes = [16, 8], strides = [1, 1]} : vector<16x32xf32> to vector<16x8xf32>
    %114 = vector.shape_cast %113 : vector<16x8xf32> to vector<2x8x8xf32>
    "tpu.trace_start"() <{level = 10 : i32, message = "btd,bsd->bts"}> : () -> ()
    %cst_45 = arith.constant dense<0.000000e+00> : vector<2x8x8xf32>
    %115 = tpu.matmul %110, %112, %cst_45 {dimension_numbers = #tpu.dot_dimension_numbers<[2], [2], [1], [1], [0, 0, 0, 1, 1, 1], [0], [0]>} : vector<2x8x8xf32>, vector<2x8x8xf32>, vector<2x8x8xf32> -> vector<2x8x8xf32>
    "tpu.trace_stop"() : () -> ()
    %cst_46 = arith.constant 0.176776692 : f32
    %116 = vector.broadcast %cst_46 : f32 to vector<2x8x8xf32>
    %117 = arith.mulf %115, %116 : vector<2x8x8xf32>
    %cst_47 = arith.constant dense<0xFF800000> : vector<2x8xf32>
    %118 = vector.multi_reduction <maximumf>, %117, %cst_47 [2] : vector<2x8x8xf32> to vector<2x8xf32>
    %119 = vector.shape_cast %118 : vector<2x8xf32> to vector<2x8x1xf32>
    %120 = vector.broadcast %119 : vector<2x8x1xf32> to vector<2x8x8xf32>
    %121 = arith.subf %117, %120 : vector<2x8x8xf32>
    %122 = math.exp %121 : vector<2x8x8xf32>
    %cst_48 = arith.constant dense<0.000000e+00> : vector<2x8xf32>
    %123 = vector.multi_reduction <add>, %122, %cst_48 [2] : vector<2x8x8xf32> to vector<2x8xf32>
    %124 = vector.shape_cast %123 : vector<2x8xf32> to vector<2x8x1xf32>
    %125 = tpu.reciprocal %124 {approx = true} : vector<2x8x1xf32> -> vector<2x8x1xf32>
    %126 = vector.broadcast %125 : vector<2x8x1xf32> to vector<2x8x8xf32>
    %127 = arith.mulf %122, %126 : vector<2x8x8xf32>
    "tpu.trace_start"() <{level = 10 : i32, message = "bts,bsd->btd"}> : () -> ()
    %cst_49 = arith.constant dense<0.000000e+00> : vector<2x8x8xf32>
    %128 = tpu.matmul %127, %114, %cst_49 {dimension_numbers = #tpu.dot_dimension_numbers<[2], [1], [1], [2], [0, 0, 0, 1, 1, 2], [0], [0]>} : vector<2x8x8xf32>, vector<2x8x8xf32>, vector<2x8x8xf32> -> vector<2x8x8xf32>
    "tpu.trace_stop"() : () -> ()
    %129 = vector.shape_cast %128 : vector<2x8x8xf32> to vector<16x8xf32>
    %c3 = arith.constant 3 : index
    %c0_50 = arith.constant 0 : index
    %c0_51 = arith.constant 0 : index
    %130 = vector.load %arg6[%c3, %c0_50, %c0_51] : memref<4x8x32xf32, #tpu.memory_space<vmem>>, vector<1x8x32xf32>
    %131 = vector.shape_cast %130 : vector<1x8x32xf32> to vector<8x32xf32>
    %cst_52 = arith.constant dense<0.000000e+00> : vector<16x32xf32>
    %132 = tpu.matmul %129, %131, %cst_52 {dimension_numbers = #tpu.dot_dimension_numbers<[1], [0], [0], [1], [0, 0, 1, 1], [], []>} : vector<16x8xf32>, vector<8x32xf32>, vector<16x32xf32> -> vector<16x32xf32>
    %133 = arith.addf %108, %132 : vector<16x32xf32>
    %c0_53 = arith.constant 0 : index
    %c0_54 = arith.constant 0 : index
    %134 = vector.load %arg8[%c0_53, %c0_54] : memref<1x32xf32, #tpu.memory_space<vmem>>, vector<1x32xf32>
    %c0_55 = arith.constant 0 : index
    %c0_56 = arith.constant 0 : index
    %135 = vector.load %arg9[%c0_55, %c0_56] : memref<1x32xf32, #tpu.memory_space<vmem>>, vector<1x32xf32>
    %cst_57 = arith.constant dense<0.000000e+00> : vector<16xf32>
    %136 = vector.multi_reduction <add>, %133, %cst_57 [1] : vector<16x32xf32> to vector<16xf32>
    %137 = vector.shape_cast %136 : vector<16xf32> to vector<16x1xf32>
    %cst_58 = arith.constant 3.200000e+01 : f32
    %138 = vector.broadcast %cst_58 : f32 to vector<16x1xf32>
    %139 = arith.divf %137, %138 : vector<16x1xf32>
    %140 = vector.broadcast %139 : vector<16x1xf32> to vector<16x32xf32>
    %141 = arith.subf %133, %140 : vector<16x32xf32>
    %142 = arith.mulf %141, %141 : vector<16x32xf32>
    %cst_59 = arith.constant dense<0.000000e+00> : vector<16xf32>
    %143 = vector.multi_reduction <add>, %142, %cst_59 [1] : vector<16x32xf32> to vector<16xf32>
    %144 = vector.shape_cast %143 : vector<16xf32> to vector<16x1xf32>
    %cst_60 = arith.constant 3.200000e+01 : f32
    %145 = vector.broadcast %cst_60 : f32 to vector<16x1xf32>
    %146 = arith.divf %144, %145 : vector<16x1xf32>
    %147 = vector.broadcast %139 : vector<16x1xf32> to vector<16x32xf32>
    %148 = arith.subf %133, %147 : vector<16x32xf32>
    %cst_61 = arith.constant 9.99999974E-6 : f32
    %149 = vector.broadcast %cst_61 : f32 to vector<16x1xf32>
    %150 = arith.addf %146, %149 : vector<16x1xf32>
    %151 = math.rsqrt %150 : vector<16x1xf32>
    %152 = vector.broadcast %151 : vector<16x1xf32> to vector<16x32xf32>
    %153 = arith.mulf %148, %152 : vector<16x32xf32>
    %154 = vector.broadcast %134 : vector<1x32xf32> to vector<16x32xf32>
    %155 = arith.mulf %153, %154 : vector<16x32xf32>
    %156 = vector.broadcast %135 : vector<1x32xf32> to vector<16x32xf32>
    %157 = arith.addf %155, %156 : vector<16x32xf32>
    %c0_62 = arith.constant 0 : index
    %c0_63 = arith.constant 0 : index
    %158 = vector.load %arg10[%c0_62, %c0_63] : memref<32x128xf32, #tpu.memory_space<vmem>>, vector<32x128xf32>
    %cst_64 = arith.constant dense<0.000000e+00> : vector<16x128xf32>
    %159 = tpu.matmul %157, %158, %cst_64 {dimension_numbers = #tpu.dot_dimension_numbers<[1], [0], [0], [1], [0, 0, 1, 1], [], []>} : vector<16x32xf32>, vector<32x128xf32>, vector<16x128xf32> -> vector<16x128xf32>
    %c0_65 = arith.constant 0 : index
    %c0_66 = arith.constant 0 : index
    %160 = vector.load %arg11[%c0_65, %c0_66] : memref<1x128xf32, #tpu.memory_space<vmem>>, vector<1x128xf32>
    %161 = vector.broadcast %160 : vector<1x128xf32> to vector<16x128xf32>
    %162 = arith.addf %159, %161 : vector<16x128xf32>
    %cst_67 = arith.constant 0.000000e+00 : f32
    %163 = vector.broadcast %cst_67 : f32 to vector<16x128xf32>
    %164 = arith.maximumf %162, %163 : vector<16x128xf32>
    %c0_68 = arith.constant 0 : index
    %c0_69 = arith.constant 0 : index
    %165 = vector.load %arg12[%c0_68, %c0_69] : memref<128x32xf32, #tpu.memory_space<vmem>>, vector<128x32xf32>
    %cst_70 = arith.constant dense<0.000000e+00> : vector<16x32xf32>
    %166 = tpu.matmul %164, %165, %cst_70 {dimension_numbers = #tpu.dot_dimension_numbers<[1], [0], [0], [1], [0, 0, 1, 1], [], []>} : vector<16x128xf32>, vector<128x32xf32>, vector<16x32xf32> -> vector<16x32xf32>
    %c0_71 = arith.constant 0 : index
    %c0_72 = arith.constant 0 : index
    %167 = vector.load %arg13[%c0_71, %c0_72] : memref<1x32xf32, #tpu.memory_space<vmem>>, vector<1x32xf32>
    %168 = vector.broadcast %167 : vector<1x32xf32> to vector<16x32xf32>
    %169 = arith.addf %166, %168 : vector<16x32xf32>
    %170 = arith.addf %133, %169 : vector<16x32xf32>
    %c0_73 = arith.constant 0 : index
    %c0_74 = arith.constant 0 : index
    %171 = vector.load %arg14[%c0_73, %c0_74] : memref<16x32xf32, #tpu.memory_space<vmem>>, vector<16x32xf32>
    tpu.vector_store %arg14[%c0_73, %c0_74], %170 {strides = array<i32>} : memref<16x32xf32, #tpu.memory_space<vmem>>, vector<16x32xf32>,
    return
  }
}

</mosaic_0001>

<bundles_post_ra>
// kernel: block_forward.1
= control target key start
LH: loop header
LB: loop body
LE: loop exit
PB: predicated region body
PF: predicated region fallthrough
CT: control target
= control target key end

     0   :  { %19 = vsyncpa [#allocation3], 0  ;;  %s3149_s0 = inlined_call_operand.vmem [shape: f32[16,32], index: 0, kind: input, shape index: {}, may-alias: {0,14}]   ;;  %s3150_s1 = inlined_call_operand.vmem [shape: f32[1,32], index: 1, kind: input, shape index: {}]   ;;  %s3151_s2 = inlined_call_operand.vmem [shape: f32[1,32], index: 2, kind: input, shape index: {}]   ;;  %s3152_s3 = inlined_call_operand.vmem [shape: f32[32,32], index: 3, kind: input, shape index: {}]   ;;  %s3153_s4 = inlined_call_operand.vmem [shape: f32[32,32], index: 4, kind: input, shape index: {}]   ;;  %s3154_s5 = inlined_call_operand.vmem [shape: f32[32,32], index: 5, kind: input, shape index: {}]   ;;  %s3155_s6 = inlined_call_operand.vmem [shape: f32[4,8,32], index: 6, kind: input, shape index: {}]   ;;  %s3156_s7 = inlined_call_operand.vmem [shape: f32[1,32], index: 7, kind: input, shape index: {}]   ;;  %s3157_s8 = inlined_call_operand.vmem [shape: f32[1,32], index: 8, kind: input, shape index: {}]   ;;  %s3158_s9 = inlined_call_operand.hbm [shape: f32[1,32], index: 9, kind: input, shape index: {}]   ;;  %s3159_s10 = inlined_call_operand.vmem [shape: f32[32,128], index: 10, kind: input, shape index: {}]   ;;  %s3160_s11 = inlined_call_operand.hbm [shape: f32[1,128], index: 11, kind: input, shape index: {}]   ;;  %s3161_s12 = inlined_call_operand.vmem [shape: f32[128,32], index: 12, kind: input, shape index: {}]   ;;  %s3162_s13 = inlined_call_operand.hbm [shape: f32[1,32], index: 13, kind: input, shape index: {}]   ;;  %s3163_s14 = inlined_call_operand.vmem [shape: f32[16,32], index: 14, kind: output, shape index: {}, may-alias: {0,14}]  }
   0x1   :  { %20 = vsyncpa [#allocation5], 0  ;;  %s2715_s29 = smov [#allocation4]   ;;  %s2716_s15 = smov [#allocation2]  }
   0x2   :  { %s57_s30 = sshll.u32 %s2715_s29, 4  ;;  %s45_s16 = sshll.u32 %s2716_s15, 4  ;;  %s58_s30 = int_to_ptr.vmem [resolvable:$true] %s57_s30  ;;  %s46_s16 = int_to_ptr.vmem [resolvable:$true] %s45_s16 }
   0x3   :  { %s2659_s17 = scalar_lea.vmem %s58_s30, 16  ;;  %s2663_s18 = scalar_lea.vmem %s58_s30, 32 }
   0x4   :  { %p2660_p0 = scmp.ne.s32.totalorder %s58_s30, %s2659_s17  ;;  %p2664_p1 = scmp.lt.s32.totalorder %s58_s30, %s58_s30 }
   0x5   :  { %p2665_p2 = scmp.lt.s32.totalorder %s2663_s18, %s2659_s17 }
   0x7   :  { %p2666_p3 = por %p2665_p2, %p2664_p1 }
   0x9   :  { %p2667_p4 = pnand %p2666_p3, %p2660_p0 }
   0xb   :  { %2670 = shalt.err (!%p2667_p4)
}
   0xc   :  { %60 = dma.hbm_to_vmem [thread:$0]  %s3160_s11, 16, %s58_s30, [#allocation5]  }
   0xd   :  { %s2679_s21 = scalar_lea.vmem %s46_s16, 16  ;;  %s2683_s22 = scalar_lea.vmem %s46_s16, 32 }
   0xe   :  { %p2680_p5 = scmp.ne.s32.totalorder %s46_s16, %s2679_s21  ;;  %p2684_p6 = scmp.lt.s32.totalorder %s46_s16, %s46_s16 }
   0xf   :  { %p2685_p7 = scmp.lt.s32.totalorder %s2683_s22, %s2679_s21 }
  0x11   :  { %p2686_p8 = por %p2685_p7, %p2684_p6 }
  0x13   :  { %p2687_p9 = pnand %p2686_p8, %p2680_p5 }
  0x15   :  { %2690 = shalt.err (!%p2687_p9)
}
  0x16   :  { %48 = dma.hbm_to_vmem [thread:$0]  %s3158_s9, 16, %s46_s16, [#allocation3]  }
  0x17   :  { %s2717_s25 = smov [#allocation6]  }
  0x18   :  { %s69_s26 = sshll.u32 %s2717_s25, 4  ;;  %s70_s26 = int_to_ptr.vmem [resolvable:$true] %s69_s26 }
  0x19   :  { %s2699_s27 = scalar_lea.vmem %s70_s26, 16  ;;  %s2703_s28 = scalar_lea.vmem %s70_s26, 32 }
  0x1a   :  { %p2700_p10 = scmp.ne.s32.totalorder %s70_s26, %s2699_s27  ;;  %p2704_p11 = scmp.lt.s32.totalorder %s70_s26, %s70_s26 }
  0x1b   :  { %p2705_p12 = scmp.lt.s32.totalorder %s2703_s28, %s2699_s27 }
  0x1d   :  { %p2706_p13 = por %p2705_p12, %p2704_p11 }
  0x1f   :  { %p2707_p0 = pnand %p2706_p13, %p2700_p10 }
  0x21   :  { %2710 = shalt.err (!%p2707_p0)
}
  0x22   :  { %72 = dma.hbm_to_vmem [thread:$0]  %s3162_s13, 16, %s70_s26, [#allocation5]  }
  0x23   :  { %2711 = dma.done.wait [#allocation3], 16  }
  0x24   :  { %2712 = vsyncadd [#allocation3], 4294967280 }
  0x25   :  { %2713 = dma.done.wait [#allocation5], 32  }
  0x26   :  { %2714 = vsyncadd [#allocation5], 4294967264  ;;  %vm86_vm0 = vcmask 261120   ;;  %v2810_v0 = vld [vmem:[%s3149_s0] sm:$0xff]  ;;  %v2815_v1 = vld [vmem:[%s3149_s0 + $0x8] sm:$0xff]  ;;  %v2718_v42 = vmov 0.0  }
  0x27   :  { %v87_v2 = vsel %vm86_vm0, %v2810_v0, 0.0  ;;  %v90_v3 = vsel %vm86_vm0, %v2815_v1, 0.0  ;;  %v133_v14 = vld [vmem:[%s3152_s3 + $0x18] sm:$0xff]  ;;  %v132_v15 = vld [vmem:[%s3152_s3 + $0x10] sm:$0xff]  ;;  %v131_v16 = vld [vmem:[%s3152_s3 + $0x8] sm:$0xff]  ;;  %2462 = vmatprep.subr.mxu1 %v2718_v42  ;;  %vm2719_vm1 = vmmov 0  }
  0x28   :  { %88 = vadd.xlane.f32.xlu0 %v87_v2  ;;  %2424 = vmatprep.subr.mxu0 %v133_v14  ;;  %v130_v17 = vld [vmem:[%s3152_s3] sm:$0xff]  ;;  %v218_v18 = vld [vmem:[%s3153_s4 + $0x18] sm:$0xff]  ;;  %v217_v35 = vld [vmem:[%s3153_s4 + $0x10] sm:$0xff]  ;;  %vm382_vm2 = vcmask 64512   ;;  %s2721_s21 = smov 112  }
  0x29   :  { %2425 = vmatpush3.msra.mxu0 %v133_v14  ;;  %v2288_v26 = vld [vmem:[%s3150_s1] ss:$0 sm:$0xff]  ;;  %v216_v36 = vld [vmem:[%s3153_s4 + $0x8] sm:$0xff]  ;;  %v297_v38 = vld [vmem:[%s3154_s5 + $0x18] sm:$0xff]  ;;  %2464 = vmatprep.mubr.msk.f32.mxu1 %vm2719_vm1, %v2718_v42 }
  0x2a   :  { %2426 = vmatprep.subr.mxu0 %v132_v15  ;;  %v2289_v28 = vld [vmem:[%s3151_s2] ss:$0 sm:$0xff]  ;;  %v296_v39 = vld [vmem:[%s3154_s5 + $0x10] sm:$0xff]  ;;  %v295_v40 = vld [vmem:[%s3154_s5 + $0x8] sm:$0xff] }
  0x2b   :  { %2427 = vmatpush3.msra.mxu0 %v132_v15  ;;  %v215_v37 = vld [vmem:[%s3153_s4] sm:$0xff] }
  0x2c   :  { %91 = vadd.xlane.f32.xlu0 %v90_v3  ;;  %2428 = vmatprep.subr.mxu0 %v131_v16  ;;  %v294_v41 = vld [vmem:[%s3154_s5] sm:$0xff]  ;;  %s2720_s5 = smov 120  }
  0x2d   :  { %2429 = vmatpush3.msra.mxu0 %v131_v16  ;;  %v705_v14 = vld [vmem:[%s3155_s6] sm:$0xff] }
  0x2e   :  { %2430 = vmatprep.subr.mxu0 %v130_v17 }
  0x2f   :  { %2431 = vmatpush3.msra.mxu0 %v130_v17 }
  0x30   :  { %2435 = vmatprep.subr.mxu0 %v218_v18 }
  0xb1   :  { %v89_v4 = vpop.xlane.xlu0 %88 }
  0xb2   :  { %v94_v5 = vmul.f32 0.03125, %v89_v4 }
  0xb4   :  { %v96_v6 = vsub.f32 %v2810_v0, %v94_v5 }
  0xb5   :  { %v92_v7 = vpop.xlane.xlu0 %91 }
  0xb6   :  { %v95_v8 = vmul.f32 0.03125, %v92_v7  ;;  %v98_v9 = vmul.f32 %v96_v6, %v96_v6 }
  0xb8   :  { %v97_v10 = vsub.f32 %v2815_v1, %v95_v8  ;;  %v100_v11 = vsel %vm86_vm0, %v98_v9, 0.0 }
  0xb9   :  { %101 = vadd.xlane.f32.xlu1 %v100_v11 }
  0xba   :  { %v99_v12 = vmul.f32 %v97_v10, %v97_v10 }
  0xbc   :  { %v103_v13 = vsel %vm86_vm0, %v99_v12, 0.0 }
  0xbd   :  { %104 = vadd.xlane.f32.xlu1 %v103_v13 }
 0x142   :  { %v102_v19 = vpop.xlane.xlu1 %101 }
 0x143   :  { %v106_v20 = vmul.f32 0.03125, %v102_v19 }
 0x145   :  { %v108_v21 = vadd.f32 1e-05, %v106_v20 }
 0x146   :  { %v105_v22 = vpop.xlane.xlu1 %104 }
 0x147   :  { %2611 = vrsqrt.f32 %v108_v21  ;;  %v107_v23 = vmul.f32 0.03125, %v105_v22 }
 0x149   :  { %v109_v24 = vadd.f32 1e-05, %v107_v23 }
 0x14b   :  { %2613 = vrsqrt.f32 %v109_v24 }
 0x154   :  { %v2612_v25 = vpop.eup %2611 }
 0x155   :  { %v112_v27 = vmul.f32 %v2612_v25, %v96_v6 }
 0x157   :  { %v120_v29 = vmul.f32 %v2288_v26, %v112_v27 }
 0x158   :  { %v2614_v30 = vpop.eup %2613 }
 0x159   :  { %v113_v31 = vmul.f32 %v2614_v30, %v97_v10  ;;  %v128_v32 = vadd.f32 %v2289_v28, %v120_v29 }
 0x15b   :  { %v121_v33 = vmul.f32 %v2288_v26, %v113_v31  ;;  %2432 = vmatprep.mubr.msk.f32.mxu0 %vm86_vm0, %v128_v32 }
 0x15d   :  { %v129_v34 = vadd.f32 %v2289_v28, %v121_v33 }
 0x15f   :  { %2433 = vmatmul.mubr.msk.f32.vlgmr.msra.gmra.mxu0 %vm86_vm0, %v129_v34 }
 0x160   :  { %2436 = vmatpush3.msra.mxu0 %v218_v18  ;;  %2443 = vmatprep.mubr.msk.f32.mxu0 %vm86_vm0, %v128_v32 }
 0x161   :  { %2437 = vmatprep.subr.mxu0 %v217_v35 }
 0x162   :  { %2438 = vmatpush3.msra.mxu0 %v217_v35 }
 0x163   :  { %2439 = vmatprep.subr.mxu0 %v216_v36 }
 0x164   :  { %2440 = vmatpush3.msra.mxu0 %v216_v36 }
 0x165   :  { %2441 = vmatprep.subr.mxu0 %v215_v37 }
 0x166   :  { %2442 = vmatpush3.msra.mxu0 %v215_v37 }
 0x167   :  { %2444 = vmatmul.mubr.msk.f32.vlgmr.msra.gmra.mxu0 %vm86_vm0, %v129_v34  ;;  %2446 = vmatprep.subr.mxu0 %v297_v38 }
 0x168   :  { %2447 = vmatpush3.msra.mxu0 %v297_v38  ;;  %2454 = vmatprep.mubr.msk.f32.mxu0 %vm86_vm0, %v128_v32 }
 0x169   :  { %2448 = vmatprep.subr.mxu0 %v296_v39 }
 0x16a   :  { %2449 = vmatpush3.msra.mxu0 %v296_v39 }
 0x16b   :  { %2450 = vmatprep.subr.mxu0 %v295_v40 }
 0x16c   :  { %2451 = vmatpush3.msra.mxu0 %v295_v40 }
 0x16d   :  { %2452 = vmatprep.subr.mxu0 %v294_v41 }
 0x16e   :  { %2453 = vmatpush3.msra.mxu0 %v294_v41 }
 0x16f   :  { %2455 = vmatmul.mubr.msk.f32.vlgmr.msra.gmra.mxu0 %vm86_vm0, %v129_v34  ;;  %2457 = vmatprep.subr.mxu0 %v2718_v42 }
 0x170   :  { %2459 = vmatprep.mubr.msk.f32.mxu0 %vm2719_vm1, %v2718_v42 }
 0x21f   :  { %v2879_v43 = vpop.f32.mrf.mxu0 }
 0x221   :  { %v2881_v44 = vpop.f32.mrf.mxu0 }
 0x227   :  { %v2883_v45 = vpop.f32.mrf.mxu0 }
 0x228   :  { %2463 = vmatpush3.xpose.msk.msra.mxu1 %vm382_vm2, %v2883_v45 }
 0x229   :  { %v2887_v46 = vpop.f32.mrf.mxu0  ;;  %2472 = vmatprep.subr.mxu1 %v2718_v42 }
 0x22a   :  { %2458 = vmatpush3.xpose.msk.msra.mxu0 %vm382_vm2, %v2887_v46 }
 0x22b   :  { %2465 = vmatmul.mubr.msk.f32.vlgmr.msra.gmra.mxu1 %vm382_vm2, %v2879_v43  ;;  %2467 = vmatprep.subr.mxu0 %v2718_v42 }
 0x22c   :  { %2474 = vmatprep.mubr.msk.f32.mxu1 %vm2719_vm1, %v2718_v42 }
 0x22d   :  { %2460 = vmatmul.mubr.msk.f32.vlgmr.msra.gmra.mxu0 %vm382_vm2, %v2881_v44 }
 0x22e   :  { %2469 = vmatprep.mubr.msk.f32.mxu0 %vm2719_vm1, %v2718_v42 }
 0x22f   :  { %v2901_v47 = vpop.f32.mrf.mxu0 }
 0x230   :  { %2473 = vmatpush3.msra.mxu1 %v2901_v47 }
 0x231   :  { %v2904_v48 = vpop.f32.mrf.mxu0  ;;  %2482 = vmatprep.subr.mxu1 %v2718_v42 }
 0x232   :  { %2468 = vmatpush3.msra.mxu0 %v2904_v48 }
 0x233   :  { %2477 = vmatprep.subr.mxu0 %v705_v14 }
 0x2eb   :  { %v531_v49 = vpop.f32.mrf.mxu1 }
 0x2ec   :  { %v536_v50 = vmul.f32 0.17677669, %v531_v49 }
 0x2ed   :  { %v455_v51 = vpop.f32.mrf.mxu0  ;;  %v2466_v52 = vpop.f32.mrf.mxu1 }
 0x2ee   :  { %v535_v53 = vmul.f32 0.17677669, %v455_v51  ;;  %v540_v54 = vsel %vm382_vm2, %v536_v50, -inf }
 0x2ef   :  { %541 = vmax.xlane.f32.xlu1 %v540_v54  ;;  %v2461_v55 = vpop.f32.mrf.mxu0 }
 0x2f0   :  { %v537_v56 = vsel %vm382_vm2, %v535_v53, -inf }
 0x2f1   :  { %538 = vmax.xlane.f32.xlu0 %v537_v56 }
 0x378   :  { %v542_v57 = vpop.xlane.xlu1 %541 }
 0x379   :  { %v544_v58 = vsub.f32 %v536_v50, %v542_v57  ;;  %v2311_v57 = vld [vmem:[%s3155_s6 + $0x8] sm:$0xff] }
 0x37a   :  { %v539_v59 = vpop.xlane.xlu0 %538 }
 0x37b   :  { %v547_v60 = vmul.f32 1.442695, %v544_v58  ;;  %v543_v61 = vsub.f32 %v535_v53, %v539_v59 }
 0x37d   :  { %2615 = vpow2.f32 %v547_v60  ;;  %v545_v62 = vmul.f32 1.442695, %v543_v61 }
 0x37f   :  { %2617 = vpow2.f32 %v545_v62 }
 0x38a   :  { %v2616_v63 = vpop.eup %2615 }
 0x38b   :  { %v552_v2 = vsel %vm382_vm2, %v2616_v63, 0.0 }
 0x38c   :  { %v2618_v3 = vpop.eup %2617  ;;  %553 = vadd.xlane.f32.xlu1 %v552_v2 }
 0x38d   :  { %v549_v4 = vsel %vm382_vm2, %v2618_v3, 0.0 }
 0x38e   :  { %550 = vadd.xlane.f32.xlu0 %v549_v4 }
 0x39d   :  { %869 = vrot.lane.b32.xlu1 %v2883_v45, %s2720_s5 }
 0x3a1   :  { %789 = vrot.lane.b32.xlu1 %v2881_v44, %s2720_s5 }
 0x3a4   :  { %791 = vrot.lane.b32.xlu0 %v2887_v46, %s2720_s5 }
 0x3a5   :  { %867 = vrot.lane.b32.xlu1 %v2879_v43, %s2720_s5 }
 0x415   :  { %v554_v5 = vpop.xlane.xlu1 %553 }
 0x416   :  { %2619 = vrcp.f32 %v554_v5 }
 0x417   :  { %v551_v6 = vpop.xlane.xlu0 %550 }
 0x418   :  { %2621 = vrcp.f32 %v551_v6 }
 0x419   :  { %v870_v8 = vpop.permute.xlu1 %869 }
 0x41b   :  { %v792_v11 = vpop.permute.xlu0 %791 }
 0x41d   :  { %v790_v13 = vpop.permute.xlu1 %789 }
 0x421   :  { %v868_v22 = vpop.permute.xlu1 %867 }
 0x423   :  { %v2620_v7 = vpop.eup %2619 }
 0x424   :  { %v558_v9 = vmul.f32 %v2620_v7, %v2616_v63 }
 0x425   :  { %v2622_v10 = vpop.eup %2621 }
 0x426   :  { %2475 = vmatmul.mubr.msk.f32.vlgmr.msra.gmra.mxu1 %vm382_vm2, %v558_v9  ;;  %v557_v12 = vmul.f32 %v2622_v10, %v2618_v3 }
 0x427   :  { %2483 = vmatpush3.xpose.msk.msra.mxu1 %vm382_vm2, %v792_v11  ;;  %2484 = vmatprep.mubr.msk.f32.mxu1 %vm2719_vm1, %v2718_v42  ;;  %v2296_v11 = vld [vmem:[%s3156_s7] ss:$0 sm:$0xff]  ;;  %s2722_s7 = smov 104  }
 0x428   :  { %2470 = vmatmul.mubr.msk.f32.vlgmr.msra.gmra.mxu0 %vm382_vm2, %v557_v12  ;;  %2492 = vmatprep.subr.mxu1 %v2718_v42  ;;  %v381_v12 = vadd.f32 %v2296_v11, %v2815_v1 }
 0x429   :  { %2478 = vmatpush3.msra.mxu0 %v705_v14 }
 0x42a   :  { %2485 = vmatmul.mubr.msk.f32.vlgmr.msra.gmra.mxu1 %vm382_vm2, %v790_v13  ;;  %2487 = vmatprep.subr.mxu0 %v2718_v42  ;;  %v380_v13 = vadd.f32 %v2296_v11, %v2810_v0 }
 0x42b   :  { %2494 = vmatprep.mubr.msk.f32.mxu1 %vm2719_vm1, %v2718_v42 }
 0x4e6   :  { %v701_v15 = vpop.f32.mrf.mxu1 }
 0x4e8   :  { %v628_v16 = vpop.f32.mrf.mxu0  ;;  %v2476_v17 = vpop.f32.mrf.mxu1 }
 0x4e9   :  { %2479 = vmatprep.mubr.msk.f32.mxu0 %vm382_vm2, %v628_v16 }
 0x4ea   :  { %v2471_v18 = vpop.f32.mrf.mxu0  ;;  %2480 = vmatmul.mubr.msk.f32.vlgmr.msra.gmra.mxu0 %vm382_vm2, %v701_v15  ;;  %v863_v19 = vpop.f32.mrf.mxu1 }
 0x4eb   :  { %v945_v20 = vmul.f32 0.17677669, %v863_v19  ;;  %2488 = vmatpush3.xpose.msk.msra.mxu0 %vm382_vm2, %v870_v8  ;;  %2489 = vmatprep.mubr.msk.f32.mxu0 %vm2719_vm1, %v2718_v42 }
 0x4ec   :  { %v2486_v21 = vpop.f32.mrf.mxu1  ;;  %2497 = vmatprep.subr.mxu0 %v2718_v42 }
 0x4ed   :  { %v947_v23 = vsel %vm382_vm2, %v945_v20, -inf }
 0x4ee   :  { %948 = vmax.xlane.f32.xlu0 %v947_v23  ;;  %2490 = vmatmul.mubr.msk.f32.vlgmr.msra.gmra.mxu0 %vm382_vm2, %v868_v22 }
 0x4ef   :  { %2499 = vmatprep.mubr.msk.f32.mxu0 %vm2719_vm1, %v2718_v42 }
 0x577   :  { %v949_v24 = vpop.xlane.xlu0 %948 }
 0x578   :  { %v953_v25 = vsub.f32 %v945_v20, %v949_v24 }
 0x57a   :  { %v955_v26 = vmul.f32 1.442695, %v953_v25 }
 0x57c   :  { %2623 = vpow2.f32 %v955_v26 }
 0x589   :  { %v2624_v27 = vpop.eup %2623 }
 0x58a   :  { %v959_v28 = vsel %vm382_vm2, %v2624_v27, 0.0 }
 0x58b   :  { %960 = vadd.xlane.f32.xlu0 %v959_v28 }
 0x5aa   :  { %v2944_v29 = vpop.f32.mrf.mxu0 }
 0x5ab   :  { %v788_v14 = vadd.f32 %v2944_v29, %v381_v12 }
 0x5ac   :  { %v2946_v30 = vpop.f32.mrf.mxu0 }
 0x5ad   :  { %v787_v16 = vadd.f32 %v2946_v30, %v380_v13  ;;  %v2329_v13 = vld [vmem:[%s3155_s6 + $0x18] sm:$0xff] }
 0x5ae   :  { %v941_v31 = vpop.f32.mrf.mxu0 }
 0x5af   :  { %v946_v32 = vmul.f32 0.17677669, %v941_v31 }
 0x5b0   :  { %v2491_v33 = vpop.f32.mrf.mxu0 }
 0x5b1   :  { %v950_v34 = vsel %vm382_vm2, %v946_v32, -inf  ;;  %v2320_v33 = vld [vmem:[%s3155_s6 + $0x10] sm:$0xff] }
 0x5b2   :  { %951 = vmax.xlane.f32.xlu1 %v950_v34 }
 0x5c3   :  { %1047 = vrot.lane.b32.xlu1 %v2901_v47, %s2720_s5 }
 0x5c7   :  { %1210 = vrot.lane.b32.xlu1 %v2887_v46, %s2721_s21 }
 0x5cb   :  { %1288 = vrot.lane.b32.xlu1 %v2883_v45, %s2721_s21 }
 0x5cf   :  { %1286 = vrot.lane.b32.xlu1 %v2879_v43, %s2721_s21 }
 0x614   :  { %v961_v41 = vpop.xlane.xlu0 %960 }
 0x63b   :  { %v952_v35 = vpop.xlane.xlu1 %951 }
 0x63c   :  { %v954_v36 = vsub.f32 %v946_v32, %v952_v35 }
 0x63e   :  { %v957_v37 = vmul.f32 1.442695, %v954_v36 }
 0x63f   :  { %v1048_v38 = vpop.permute.xlu1 %1047 }
 0x640   :  { %2625 = vpow2.f32 %v957_v37  ;;  %2498 = vmatpush3.msra.mxu0 %v1048_v38 }
 0x641   :  { %2507 = vmatprep.subr.mxu0 %v2718_v42  ;;  %2627 = vrcp.f32 %v961_v41 }
 0x643   :  { %v1211_v55 = vpop.permute.xlu1 %1210 }
 0x647   :  { %v1289_v60 = vpop.permute.xlu1 %1288 }
 0x64b   :  { %v1287_v63 = vpop.permute.xlu1 %1286 }
 0x64d   :  { %v2626_v39 = vpop.eup %2625 }
 0x64e   :  { %v962_v40 = vsel %vm382_vm2, %v2626_v39, 0.0  ;;  %v2628_v50 = vpop.eup %2627 }
 0x64f   :  { %963 = vadd.xlane.f32.xlu0 %v962_v40  ;;  %v967_v52 = vmul.f32 %v2628_v50, %v2624_v27 }
 0x665   :  { %970 = vrot.lane.b32.xlu0 %v2904_v48, %s2720_s5 }
 0x669   :  { %1208 = vrot.lane.b32.xlu0 %v2881_v44, %s2721_s21 }
 0x6d8   :  { %v964_v49 = vpop.xlane.xlu0 %963 }
 0x6d9   :  { %2629 = vrcp.f32 %v964_v49 }
 0x6dc   :  { %v971_v51 = vpop.permute.xlu0 %970 }
 0x6dd   :  { %2493 = vmatpush3.msra.mxu1 %v971_v51 }
 0x6de   :  { %2495 = vmatmul.mubr.msk.f32.vlgmr.msra.gmra.mxu1 %vm382_vm2, %v967_v52  ;;  %2502 = vmatprep.subr.mxu1 %v2311_v57 }
 0x6df   :  { %2503 = vmatpush3.msra.mxu1 %v2311_v57 }
 0x6e0   :  { %v1209_v56 = vpop.permute.xlu0 %1208  ;;  %2512 = vmatprep.subr.mxu1 %v2718_v42 }
 0x6e6   :  { %v2630_v53 = vpop.eup %2629 }
 0x6e7   :  { %v968_v54 = vmul.f32 %v2630_v53, %v2626_v39 }
 0x6e9   :  { %2500 = vmatmul.mubr.msk.f32.vlgmr.msra.gmra.mxu0 %vm382_vm2, %v968_v54 }
 0x6ea   :  { %2508 = vmatpush3.xpose.msk.msra.mxu0 %vm382_vm2, %v1211_v55  ;;  %2509 = vmatprep.mubr.msk.f32.mxu0 %vm2719_vm1, %v2718_v42 }
 0x6eb   :  { %2517 = vmatprep.subr.mxu0 %v2718_v42 }
 0x6ed   :  { %2510 = vmatmul.mubr.msk.f32.vlgmr.msra.gmra.mxu0 %vm382_vm2, %v1209_v56 }
 0x6ee   :  { %2519 = vmatprep.mubr.msk.f32.mxu0 %vm2719_vm1, %v2718_v42 }
 0x79e   :  { %v1042_v58 = vpop.f32.mrf.mxu1 }
 0x79f   :  { %2504 = vmatprep.mubr.msk.f32.mxu1 %vm382_vm2, %v1042_v58 }
 0x7a0   :  { %v2496_v59 = vpop.f32.mrf.mxu1 }
 0x7a9   :  { %v1119_v61 = vpop.f32.mrf.mxu0 }
 0x7aa   :  { %2505 = vmatmul.mubr.msk.f32.vlgmr.msra.gmra.mxu1 %vm382_vm2, %v1119_v61 }
 0x7ab   :  { %2513 = vmatpush3.xpose.msk.msra.mxu1 %vm382_vm2, %v1289_v60  ;;  %v2501_v62 = vpop.f32.mrf.mxu0  ;;  %2514 = vmatprep.mubr.msk.f32.mxu1 %vm2719_vm1, %v2718_v42 }
 0x7ac   :  { %2522 = vmatprep.subr.mxu1 %v2718_v42 }
 0x7ad   :  { %v1282_v2 = vpop.f32.mrf.mxu0 }
 0x7ae   :  { %v1364_v3 = vmul.f32 0.17677669, %v1282_v2  ;;  %2515 = vmatmul.mubr.msk.f32.vlgmr.msra.gmra.mxu1 %vm382_vm2, %v1287_v63 }
 0x7af   :  { %v2511_v4 = vpop.f32.mrf.mxu0  ;;  %2524 = vmatprep.mubr.msk.f32.mxu1 %vm2719_vm1, %v2718_v42 }
 0x7b0   :  { %v1366_v5 = vsel %vm382_vm2, %v1364_v3, -inf }
 0x7b1   :  { %1367 = vmax.xlane.f32.xlu0 %v1366_v5 }
 0x83a   :  { %v1368_v6 = vpop.xlane.xlu0 %1367 }
 0x83b   :  { %v1372_v7 = vsub.f32 %v1364_v3, %v1368_v6 }
 0x83d   :  { %v1374_v8 = vmul.f32 1.442695, %v1372_v7 }
 0x83f   :  { %2631 = vpow2.f32 %v1374_v8 }
 0x84c   :  { %v2632_v9 = vpop.eup %2631 }
 0x84d   :  { %v1378_v10 = vsel %vm382_vm2, %v2632_v9, 0.0 }
 0x84e   :  { %1379 = vadd.xlane.f32.xlu0 %v1378_v10 }
 0x86a   :  { %v2506_v15 = vpop.f32.mrf.mxu1 }
 0x86b   :  { %v2994_v17 = vadd.f32 %v2506_v15, %v788_v14 }
 0x86c   :  { %v1197_v18 = vpop.f32.mrf.mxu1 }
 0x86d   :  { %v2996_v19 = vadd.f32 %v1197_v18, %v787_v16 }
 0x86e   :  { %v1360_v20 = vpop.f32.mrf.mxu1 }
 0x86f   :  { %v1365_v21 = vmul.f32 0.17677669, %v1360_v20 }
 0x870   :  { %v2516_v22 = vpop.f32.mrf.mxu1 }
 0x871   :  { %v1369_v23 = vsel %vm382_vm2, %v1365_v21, -inf }
 0x872   :  { %1370 = vmax.xlane.f32.xlu1 %v1369_v23 }
 0x883   :  { %1464 = vrot.lane.b32.xlu1 %v2901_v47, %s2721_s21 }
 0x887   :  { %1627 = vrot.lane.b32.xlu1 %v2887_v46, %s2722_s7 }
 0x88b   :  { %1705 = vrot.lane.b32.xlu1 %v2883_v45, %s2722_s7 }
 0x88f   :  { %1703 = vrot.lane.b32.xlu1 %v2879_v43, %s2722_s7 }
 0x8d7   :  { %v1380_v45 = vpop.xlane.xlu0 %1379 }
 0x8fb   :  { %v1371_v0 = vpop.xlane.xlu1 %1370 }
 0x8fc   :  { %v1373_v1 = vsub.f32 %v1365_v21, %v1371_v0 }
 0x8fe   :  { %v1376_v24 = vmul.f32 1.442695, %v1373_v1 }
 0x8ff   :  { %v1465_v25 = vpop.permute.xlu1 %1464 }
 0x900   :  { %2633 = vpow2.f32 %v1376_v24  ;;  %2523 = vmatpush3.msra.mxu1 %v1465_v25 }
 0x901   :  { %2532 = vmatprep.subr.mxu1 %v2718_v42  ;;  %2635 = vrcp.f32 %v1380_v45 }
 0x903   :  { %v1628_v32 = vpop.permute.xlu1 %1627 }
 0x907   :  { %v1706_v36 = vpop.permute.xlu1 %1705 }
 0x90b   :  { %v1704_v39 = vpop.permute.xlu1 %1703 }
 0x90d   :  { %v2634_v26 = vpop.eup %2633 }
 0x90e   :  { %v1381_v27 = vsel %vm382_vm2, %v2634_v26, 0.0  ;;  %v2636_v46 = vpop.eup %2635 }
 0x90f   :  { %1382 = vadd.xlane.f32.xlu0 %v1381_v27  ;;  %v1386_v29 = vmul.f32 %v2636_v46, %v2632_v9 }
 0x925   :  { %1388 = vrot.lane.b32.xlu0 %v2904_v48, %s2721_s21 }
 0x929   :  { %1625 = vrot.lane.b32.xlu0 %v2881_v44, %s2722_s7 }
 0x998   :  { %v1383_v43 = vpop.xlane.xlu0 %1382 }
 0x999   :  { %2637 = vrcp.f32 %v1383_v43 }
 0x99c   :  { %v1389_v28 = vpop.permute.xlu0 %1388 }
 0x99d   :  { %2518 = vmatpush3.msra.mxu0 %v1389_v28  ;;  %v2089_v28 = vld [vmem:[%s3159_s10 + $0x18] sm:$0xff] }
 0x99e   :  { %2520 = vmatmul.mubr.msk.f32.vlgmr.msra.gmra.mxu0 %vm382_vm2, %v1386_v29  ;;  %2527 = vmatprep.subr.mxu0 %v2320_v33  ;;  %v2088_v29 = vld [vmem:[%s3159_s10 + $0x10] sm:$0xff] }
 0x99f   :  { %2528 = vmatpush3.msra.mxu0 %v2320_v33  ;;  %v2193_v33 = vld [vmem:[%s3161_s12 + $0x68] sm:$0xff] }
 0x9a0   :  { %v1626_v44 = vpop.permute.xlu0 %1625  ;;  %2537 = vmatprep.subr.mxu0 %v2718_v42 }
 0x9a6   :  { %v2638_v30 = vpop.eup %2637 }
 0x9a7   :  { %v1387_v31 = vmul.f32 %v2638_v30, %v2634_v26  ;;  %v2087_v30 = vld [vmem:[%s3159_s10 + $0x8] sm:$0xff] }
 0x9a9   :  { %2525 = vmatmul.mubr.msk.f32.vlgmr.msra.gmra.mxu1 %vm382_vm2, %v1387_v31  ;;  %v2086_v31 = vld [vmem:[%s3159_s10] sm:$0xff] }
 0x9aa   :  { %2533 = vmatpush3.xpose.msk.msra.mxu1 %vm382_vm2, %v1628_v32  ;;  %2534 = vmatprep.mubr.msk.f32.mxu1 %vm2719_vm1, %v2718_v42  ;;  %v2195_v32 = vld [vmem:[%s3161_s12 + $0x78] sm:$0xff] }
 0x9ab   :  { %2542 = vmatprep.subr.mxu1 %v2718_v42 }
 0x9ad   :  { %2535 = vmatmul.mubr.msk.f32.vlgmr.msra.gmra.mxu1 %vm382_vm2, %v1626_v44  ;;  %v2194_v44 = vld [vmem:[%s3161_s12 + $0x70] sm:$0xff] }
 0x9ae   :  { %2544 = vmatprep.mubr.msk.f32.mxu1 %vm2719_vm1, %v2718_v42 }
 0xa5e   :  { %v1460_v34 = vpop.f32.mrf.mxu0 }
 0xa5f   :  { %2529 = vmatprep.mubr.msk.f32.mxu0 %vm382_vm2, %v1460_v34  ;;  %v2192_v34 = vld [vmem:[%s3161_s12 + $0x60] sm:$0xff] }
 0xa60   :  { %v2521_v35 = vpop.f32.mrf.mxu0 }
 0xa61   :  { %v2191_v35 = vld [vmem:[%s3161_s12 + $0x58] sm:$0xff] }
 0xa69   :  { %v1536_v37 = vpop.f32.mrf.mxu1 }
 0xa6a   :  { %2530 = vmatmul.mubr.msk.f32.vlgmr.msra.gmra.mxu0 %vm382_vm2, %v1536_v37  ;;  %v2189_v37 = vld [vmem:[%s3161_s12 + $0x48] sm:$0xff] }
 0xa6b   :  { %2538 = vmatpush3.xpose.msk.msra.mxu0 %vm382_vm2, %v1706_v36  ;;  %v2526_v38 = vpop.f32.mrf.mxu1  ;;  %2539 = vmatprep.mubr.msk.f32.mxu0 %vm2719_vm1, %v2718_v42  ;;  %v2190_v36 = vld [vmem:[%s3161_s12 + $0x50] sm:$0xff] }
 0xa6c   :  { %2547 = vmatprep.subr.mxu0 %v2718_v42  ;;  %v2188_v38 = vld [vmem:[%s3161_s12 + $0x40] sm:$0xff] }
 0xa6d   :  { %v1699_v40 = vpop.f32.mrf.mxu1 }
 0xa6e   :  { %v1781_v41 = vmul.f32 0.17677669, %v1699_v40  ;;  %2540 = vmatmul.mubr.msk.f32.vlgmr.msra.gmra.mxu0 %vm382_vm2, %v1704_v39  ;;  %v2187_v39 = vld [vmem:[%s3161_s12 + $0x38] sm:$0xff]  ;;  %v2186_v40 = vld [vmem:[%s3161_s12 + $0x30] sm:$0xff] }
 0xa6f   :  { %v2536_v49 = vpop.f32.mrf.mxu1  ;;  %2549 = vmatprep.mubr.msk.f32.mxu0 %vm2719_vm1, %v2718_v42 }
 0xa70   :  { %v1783_v50 = vsel %vm382_vm2, %v1781_v41, -inf  ;;  %v2184_v49 = vld [vmem:[%s3161_s12 + $0x20] sm:$0xff] }
 0xa71   :  { %1784 = vmax.xlane.f32.xlu0 %v1783_v50 }
 0xafa   :  { %v1785_v51 = vpop.xlane.xlu0 %1784 }
 0xafb   :  { %v1789_v52 = vsub.f32 %v1781_v41, %v1785_v51  ;;  %v2185_v41 = vld [vmem:[%s3161_s12 + $0x28] sm:$0xff] }
 0xafd   :  { %v1791_v53 = vmul.f32 1.442695, %v1789_v52 }
 0xaff   :  { %2639 = vpow2.f32 %v1791_v53 }
 0xb0c   :  { %v2640_v54 = vpop.eup %2639 }
 0xb0d   :  { %v1795_v55 = vsel %vm382_vm2, %v2640_v54, 0.0 }
 0xb0e   :  { %1796 = vadd.xlane.f32.xlu0 %v1795_v55 }
 0xb2a   :  { %v2531_v56 = vpop.f32.mrf.mxu0 }
 0xb2b   :  { %v1624_v57 = vadd.f32 %v2531_v56, %v2994_v17 }
 0xb2c   :  { %v1614_v58 = vpop.f32.mrf.mxu0 }
 0xb2d   :  { %v1623_v59 = vadd.f32 %v1614_v58, %v2996_v19 }
 0xb2e   :  { %v1777_v60 = vpop.f32.mrf.mxu0 }
 0xb2f   :  { %v1782_v61 = vmul.f32 0.17677669, %v1777_v60 }
 0xb30   :  { %v2541_v42 = vpop.f32.mrf.mxu0 }
 0xb31   :  { %v1786_v62 = vsel %vm382_vm2, %v1782_v61, -inf  ;;  %v2333_v42 = vld [vmem:[#allocation2] ss:$0 sm:$0xff] }
 0xb32   :  { %1787 = vmax.xlane.f32.xlu1 %v1786_v62 }
 0xb43   :  { %1881 = vrot.lane.b32.xlu1 %v2901_v47, %s2722_s7 }
 0xb97   :  { %v1797_v7 = vpop.xlane.xlu0 %1796 }
 0xbbb   :  { %v1788_v63 = vpop.xlane.xlu1 %1787 }
 0xbbc   :  { %v1790_v2 = vsub.f32 %v1782_v61, %v1788_v63 }
 0xbbe   :  { %v1793_v3 = vmul.f32 1.442695, %v1790_v2 }
 0xbbf   :  { %v1882_v4 = vpop.permute.xlu1 %1881 }
 0xbc0   :  { %2641 = vpow2.f32 %v1793_v3  ;;  %2548 = vmatpush3.msra.mxu0 %v1882_v4  ;;  %v2183_v3 = vld [vmem:[%s3161_s12 + $0x18] sm:$0xff]  ;;  %v2182_v4 = vld [vmem:[%s3161_s12 + $0x10] sm:$0xff] }
 0xbc1   :  { %2643 = vrcp.f32 %v1797_v7  ;;  %2557 = vmatprep.subr.mxu0 %v2089_v28  ;;  %v2334_v7 = vld [vmem:[#allocation4] ss:$0 sm:$0xff] }
 0xbcd   :  { %v2642_v5 = vpop.eup %2641 }
 0xbce   :  { %v1798_v6 = vsel %vm382_vm2, %v2642_v5, 0.0  ;;  %v2644_v9 = vpop.eup %2643 }
 0xbcf   :  { %1799 = vadd.xlane.f32.xlu0 %v1798_v6  ;;  %v1803_v47 = vmul.f32 %v2644_v9, %v2640_v54  ;;  %v2180_v6 = vld [vmem:[%s3161_s12] sm:$0xff] }
 0xbe5   :  { %1805 = vrot.lane.b32.xlu0 %v2904_v48, %s2722_s7 }
 0xc58   :  { %v1800_v8 = vpop.xlane.xlu0 %1799 }
 0xc59   :  { %2645 = vrcp.f32 %v1800_v8 }
 0xc5c   :  { %v1806_v10 = vpop.permute.xlu0 %1805 }
 0xc5d   :  { %2543 = vmatpush3.msra.mxu1 %v1806_v10 }
 0xc5e   :  { %2545 = vmatmul.mubr.msk.f32.vlgmr.msra.gmra.mxu1 %vm382_vm2, %v1803_v47  ;;  %2552 = vmatprep.subr.mxu1 %v2329_v13 }
 0xc5f   :  { %2553 = vmatpush3.msra.mxu1 %v2329_v13  ;;  %v2337_v13 = vld [vmem:[#allocation6] ss:$0 sm:$0xff] }
 0xc60   :  { %2568 = vmatprep.subr.mxu1 %v2195_v32 }
 0xc66   :  { %v2646_v11 = vpop.eup %2645 }
 0xc67   :  { %v1804_v12 = vmul.f32 %v2646_v11, %v2642_v5  ;;  %v2181_v5 = vld [vmem:[%s3161_s12 + $0x8] sm:$0xff] }
 0xc69   :  { %2550 = vmatmul.mubr.msk.f32.vlgmr.msra.gmra.mxu0 %vm382_vm2, %v1804_v12 }
 0xc6a   :  { %2558 = vmatpush3.msra.mxu0 %v2089_v28 }
 0xc6b   :  { %2559 = vmatprep.subr.mxu0 %v2088_v29 }
 0xc6c   :  { %2560 = vmatpush3.msra.mxu0 %v2088_v29 }
 0xc6d   :  { %2561 = vmatprep.subr.mxu0 %v2087_v30 }
 0xc6e   :  { %2562 = vmatpush3.msra.mxu0 %v2087_v30 }
 0xc6f   :  { %2563 = vmatprep.subr.mxu0 %v2086_v31 }
 0xc70   :  { %2564 = vmatpush3.msra.mxu0 %v2086_v31 }
 0xd1e   :  { %v1877_v48 = vpop.f32.mrf.mxu1 }
 0xd1f   :  { %2554 = vmatprep.mubr.msk.f32.mxu1 %vm382_vm2, %v1877_v48 }
 0xd20   :  { %v2546_v14 = vpop.f32.mrf.mxu1 }
 0xd29   :  { %v1953_v15 = vpop.f32.mrf.mxu0 }
 0xd2a   :  { %2555 = vmatmul.mubr.msk.f32.vlgmr.msra.gmra.mxu1 %vm382_vm2, %v1953_v15 }
 0xd2b   :  { %v2551_v16 = vpop.f32.mrf.mxu0  ;;  %2569 = vmatpush3.msra.mxu1 %v2195_v32 }
 0xd2c   :  { %2570 = vmatprep.subr.mxu1 %v2194_v44 }
 0xd2d   :  { %2571 = vmatpush3.msra.mxu1 %v2194_v44 }
 0xd2e   :  { %2572 = vmatprep.subr.mxu1 %v2193_v33 }
 0xd2f   :  { %2573 = vmatpush3.msra.mxu1 %v2193_v33 }
 0xd30   :  { %2574 = vmatprep.subr.mxu1 %v2192_v34 }
 0xd31   :  { %2575 = vmatpush3.msra.mxu1 %v2192_v34 }
 0xd32   :  { %2576 = vmatprep.subr.mxu1 %v2191_v35 }
 0xd33   :  { %2577 = vmatpush3.msra.mxu1 %v2191_v35 }
 0xd34   :  { %2578 = vmatprep.subr.mxu1 %v2190_v36 }
 0xd35   :  { %2579 = vmatpush3.msra.mxu1 %v2190_v36 }
 0xd36   :  { %2580 = vmatprep.subr.mxu1 %v2189_v37 }
 0xd37   :  { %2581 = vmatpush3.msra.mxu1 %v2189_v37 }
 0xd38   :  { %2582 = vmatprep.subr.mxu1 %v2188_v38 }
 0xd39   :  { %2583 = vmatpush3.msra.mxu1 %v2188_v38 }
 0xd3a   :  { %2584 = vmatprep.subr.mxu1 %v2187_v39 }
 0xd3b   :  { %2585 = vmatpush3.msra.mxu1 %v2187_v39 }
 0xd3c   :  { %2586 = vmatprep.subr.mxu1 %v2186_v40 }
 0xd3d   :  { %2587 = vmatpush3.msra.mxu1 %v2186_v40 }
 0xd3e   :  { %2588 = vmatprep.subr.mxu1 %v2185_v41 }
 0xd3f   :  { %2589 = vmatpush3.msra.mxu1 %v2185_v41 }
 0xd40   :  { %2590 = vmatprep.subr.mxu1 %v2184_v49 }
 0xd41   :  { %2591 = vmatpush3.msra.mxu1 %v2184_v49 }
 0xd42   :  { %2592 = vmatprep.subr.mxu1 %v2183_v3 }
 0xd43   :  { %2593 = vmatpush3.msra.mxu1 %v2183_v3 }
 0xd44   :  { %2594 = vmatprep.subr.mxu1 %v2182_v4 }
 0xd45   :  { %2595 = vmatpush3.msra.mxu1 %v2182_v4 }
 0xd46   :  { %2596 = vmatprep.subr.mxu1 %v2181_v5 }
 0xd47   :  { %2597 = vmatpush3.msra.mxu1 %v2181_v5 }
 0xd48   :  { %2598 = vmatprep.subr.mxu1 %v2180_v6 }
 0xd49   :  { %2599 = vmatpush3.msra.mxu1 %v2180_v6 }
 0xdea   :  { %v2556_v17 = vpop.f32.mrf.mxu1 }
 0xdeb   :  { %v3052_v18 = vadd.f32 %v2556_v17, %v1624_v57  ;;  %v2332_v57 = vld [vmem:[%s3157_s8] ss:$0 sm:$0xff] }
 0xdec   :  { %v2031_v19 = vpop.f32.mrf.mxu1 }
 0xded   :  { %v3054_v20 = vadd.f32 %v2031_v19, %v1623_v59  ;;  %v2047_v21 = vsel %vm86_vm0, %v3052_v18, 0.0 }
 0xdee   :  { %2048 = vadd.xlane.f32.xlu0 %v2047_v21 }
 0xdef   :  { %v2044_v22 = vsel %vm86_vm0, %v3054_v20, 0.0 }
 0xdf0   :  { %2045 = vadd.xlane.f32.xlu1 %v2044_v22 }
 0xe77   :  { %v2049_v23 = vpop.xlane.xlu0 %2048 }
 0xe78   :  { %v2051_v0 = vmul.f32 0.03125, %v2049_v23 }
 0xe79   :  { %v2046_v1 = vpop.xlane.xlu1 %2045 }
 0xe7a   :  { %v3061_v24 = vsub.f32 %v3052_v18, %v2051_v0  ;;  %v2050_v25 = vmul.f32 0.03125, %v2046_v1 }
 0xe7c   :  { %v3064_v26 = vsub.f32 %v3054_v20, %v2050_v25  ;;  %v2055_v27 = vmul.f32 %v3061_v24, %v3061_v24 }
 0xe7e   :  { %v2059_v45 = vsel %vm86_vm0, %v2055_v27, 0.0  ;;  %v2054_v43 = vmul.f32 %v3064_v26, %v3064_v26 }
 0xe7f   :  { %2060 = vadd.xlane.f32.xlu1 %v2059_v45 }
 0xe80   :  { %v2056_v46 = vsel %vm86_vm0, %v2054_v43, 0.0 }
 0xe81   :  { %2057 = vadd.xlane.f32.xlu0 %v2056_v46 }
 0xf08   :  { %v2061_v50 = vpop.xlane.xlu1 %2060 }
 0xf09   :  { %v2063_v51 = vmul.f32 0.03125, %v2061_v50 }
 0xf0a   :  { %v2058_v52 = vpop.xlane.xlu0 %2057 }
 0xf0b   :  { %v2065_v53 = vadd.f32 1e-05, %v2063_v51  ;;  %v2062_v54 = vmul.f32 0.03125, %v2058_v52 }
 0xf0d   :  { %2647 = vrsqrt.f32 %v2065_v53  ;;  %v2064_v55 = vadd.f32 1e-05, %v2062_v54 }
 0xf0f   :  { %2649 = vrsqrt.f32 %v2064_v55 }
 0xf1a   :  { %v2648_v56 = vpop.eup %2647 }
 0xf1b   :  { %v2069_v58 = vmul.f32 %v2648_v56, %v3061_v24 }
 0xf1c   :  { %v2650_v59 = vpop.eup %2649 }
 0xf1d   :  { %v2068_v60 = vmul.f32 %v2650_v59, %v3064_v26  ;;  %v2077_v61 = vmul.f32 %v2332_v57, %v2069_v58 }
 0xf1f   :  { %v2076_v62 = vmul.f32 %v2332_v57, %v2068_v60  ;;  %v2085_v2 = vadd.f32 %v2333_v42, %v2077_v61 }
 0xf21   :  { %v2084_v63 = vadd.f32 %v2333_v42, %v2076_v62 }
 0xf23   :  { %2565 = vmatprep.mubr.msk.f32.mxu0 %vm86_vm0, %v2084_v63 }
 0xf24   :  { %2566 = vmatmul.mubr.msk.f32.vlgmr.msra.gmra.mxu0 %vm86_vm0, %v2085_v2 }
 0xfe4   :  { %v2567_v8 = vpop.f32.mrf.mxu0 }
 0xfe5   :  { %v2175_v9 = vadd.f32 %v2567_v8, %v2334_v7 }
 0xfe6   :  { %v2169_v10 = vpop.f32.mrf.mxu0 }
 0xfe7   :  { %v2170_v47 = vadd.f32 %v2334_v7, %v2169_v10  ;;  %v2179_v12 = vmax.f32 %v2175_v9, 0.0 }
 0xfe9   :  { %v2178_v11 = vmax.f32 %v2170_v47, 0.0 }
 0xfeb   :  { %2600 = vmatprep.mubr.f32.mxu1 %v2178_v11 }
 0xfec   :  { %2601 = vmatmul.mubr.f32.vlgmr.msra.gmra.mxu1 %v2179_v12 }
0x10ac   :  { %v2602_v48 = vpop.f32.mrf.mxu1 }
0x10ad   :  { %v2275_v14 = vadd.f32 %v2602_v48, %v2337_v13 }
0x10ae   :  { %v2269_v15 = vpop.f32.mrf.mxu1 }
0x10af   :  { %v2279_v16 = vadd.f32 %v2275_v14, %v3052_v18  ;;  %v2270_v17 = vadd.f32 %v2337_v13, %v2269_v15 }
0x10b1   :  { %2281 = vst.msk [vmem:[%s3163_s14 + $0x8] sm:$0xff] %vm86_vm0, %v2279_v16  ;;  %v2278_v19 = vadd.f32 %v2270_v17, %v3054_v20 }
0x10b3   :  { %2280 = vst.msk [vmem:[%s3163_s14] sm:$0xff] %vm86_vm0, %v2278_v19 }
0x10b4   :  { %2286 = vsyncpa [#allocation3], 1 }
0x10b5   :  { %2287 = vsyncpa [#allocation5], 1 }

</bundles_post_ra>
